<compile_context>
chip_gen: v5e
topology: v5e:2x2
jax: 0.10.0
libtpu: 0.0.40
codegen_flags: <defaults>
</compile_context>

<pallas_src>
import math

import jax
import jax.numpy as jnp
from jax.experimental import pallas as pl
from jax.experimental.pallas import tpu as pltpu


def _make_kernel(s, tile_c):
    """Streaming select+scale kernel; all per-target margin math is done in the wrapper."""

    def kernel(labels_ref, tprime_ref, logits_ref, out_ref):
        j = pl.program_id(1)                               # column-tile index
        x = logits_ref[...]                                # (tile_b, tile_c), native dtype

        # Shift the (tile_b,1) label column by the tile offset instead of offsetting a
        # full-tile iota. labels == -1 go negative and can never match a column index.
        lbl_local = labels_ref[...] - j * tile_c           # (tile_b, 1) int32
        # Row-only iota (1, tile_c); the compare broadcasts it across sublanes, avoiding
        # a full (tile_b, tile_c) iota materialization every grid step.
        col = jax.lax.broadcasted_iota(jnp.int32, (1, tile_c), 1)
        is_target = col == lbl_local                       # -> (tile_b, tile_c)

        tprime = tprime_ref[...].astype(x.dtype)           # (tile_b, 1), broadcasts over lanes
        out_ref[...] = (jnp.where(is_target, tprime, x) * s).astype(out_ref.dtype)

    return kernel


def _pick_tile(dim, max_tile, quantum):
    """Largest quantum-aligned tile <= max_tile (or dim itself when it fits).

    Only accept an exact divisor of `dim` if it is within ~25% of max_tile; otherwise
    return the largest aligned tile and rely on pl.cdiv + Pallas masking the ragged
    last block. (Prevents awkward dims like 128*prime collapsing to 128-wide tiles.)
    """
    if dim <= max_tile:
        return dim
    top = max(quantum, (max_tile // quantum) * quantum)
    floor = max(quantum, (int(top * 0.75) // quantum) * quantum)
    for cand in range(top, floor - 1, -quantum):
        if dim % cand == 0:
            return cand
    return top


def combined_margin_loss(logits, labels, *, s=64.0, m1=1.0, m2=0.5, m3=0.0,
                         interclass_filtering_threshold=0,
                         tile_b=None, tile_c=None):
    """logits: [B, C] float, labels: [B] int32 (-1 = ignore). Returns [B, C]."""
    if interclass_filtering_threshold > 0:
        # TODO(synk): interclass filtering (scatter-based dirty-logit masking) not implemented; default is 0.
        raise NotImplementedError
    s, m1, m2, m3 = float(s), float(m1), float(m2), float(m3)
    arcface = (m1 == 1.0 and m3 == 0.0)
    if not arcface and not (m3 > 0):
        # mirrors the bare `raise` in the PyTorch module for unsupported combos
        raise ValueError("unsupported (m1, m2, m3) combination")

    B, C = logits.shape
    dtype_bytes = jnp.dtype(logits.dtype).itemsize

    # --- per-generation VMEM sizing -------------------------------------------
    try:
        vmem_cap = int(pltpu.get_tpu_info().vmem_capacity_bytes)   # 64 MiB v7x, 128 MiB v5e/v6e
    except Exception:
        vmem_cap = 64 * 1024 * 1024                                # conservative fallback
    vmem_limit = min((vmem_cap * 3) // 4, 96 * 1024 * 1024)
    # v5e/v6e (128 MiB VMEM) have spare room -> 3-deep pipeline on the logits input.
    # v7x (64 MiB) stays at the default double-buffering.
    deep_pipeline = vmem_cap >= 96 * 1024 * 1024 and hasattr(pl, "Buffered")
    in_bufs = 3 if deep_pipeline else 2
    # Live tiles: logits-in (in_bufs) + out (2) + labels/t' columns + headroom.
    per_buf_budget = max(vmem_limit // (in_bufs + 3), 1 << 20)

    # --- tile selection: prefer a full, contiguous class row --------------------
    if tile_c is None:
        if C * 8 * dtype_bytes <= per_buf_budget:
            tile_c = C                                             # full row: one contiguous HBM slab
        else:
            min_c = 2048 if dtype_bytes <= 2 else 1024
            max_c = max(min_c, (per_buf_budget // (8 * dtype_bytes)) // 128 * 128)
            tile_c = _pick_tile(C, max_c, 128)
    if tile_b is None:
        max_b = max(8, (per_buf_budget // max(tile_c * dtype_bytes, 1)) // 8 * 8)
        tile_b = _pick_tile(B, min(max_b, 4096), 8)

    # --- hoisted per-target margin math (B-element gather + (B,1) vector math) --
    labels_i = labels.astype(jnp.int32)
    safe_labels = jnp.clip(labels_i, 0, C - 1)                      # -1 rows gather garbage;
    t = jnp.take_along_axis(logits, safe_labels[:, None], axis=1)   # never selected in-kernel.
    t = t.astype(jnp.float32)                                       # (B, 1)
    if arcface:
        cos_m, sin_m = math.cos(m2), math.sin(m2)
        theta, sinmm = math.cos(math.pi - m2), math.sin(math.pi - m2) * m2
        # sqrt left unclamped on purpose (NaN if |t| > 1) to match torch; any NaN for
        # ignored rows is discarded by the in-kernel select.
        sin_t = jnp.sqrt(1.0 - t * t)
        cos_t_m = t * cos_m - sin_t * sin_m
        tprime = jnp.where(t > theta, cos_t_m, t - sinmm)
    else:                                                           # CosFace-style (m3 > 0)
        tprime = t - m3

    labels2d = labels_i.reshape(B, 1)
    kernel = _make_kernel(s, tile_c)

    cost = pl.CostEstimate(
        flops=3 * B * C,                       # compare + select + scale per element
        transcendentals=0,                     # sqrt hoisted to the (B,1) wrapper path
        bytes_accessed=2 * B * C * dtype_bytes + 8 * B,
    )

    grid = (pl.cdiv(B, tile_b), pl.cdiv(C, tile_c))

    def _build(use_deep):
        logits_spec_kwargs = {}
        if use_deep:
            logits_spec_kwargs["pipeline_mode"] = pl.Buffered(3)
        return pl.pallas_call(
            kernel,
            out_shape=jax.ShapeDtypeStruct((B, C), logits.dtype),
            grid_spec=pltpu.PrefetchScalarGridSpec(
                num_scalar_prefetch=0,
                grid=grid,
                in_specs=[
                    # labels / t' columns: only change when the row tile changes
                    pl.BlockSpec((tile_b, 1), lambda i, j: (i, 0)),
                    pl.BlockSpec((tile_b, 1), lambda i, j: (i, 0)),
                    # logits tile
                    pl.BlockSpec((tile_b, tile_c), lambda i, j: (i, j),
                                 **logits_spec_kwargs),
                ],
                out_specs=pl.BlockSpec((tile_b, tile_c), lambda i, j: (i, j)),
            ),
            compiler_params=pltpu.CompilerParams(
                dimension_semantics=("parallel", "parallel"),
                vmem_limit_bytes=int(vmem_limit),
            ),
            # logits (input index 2) aliases the output -> in-place semantics; no extra
            # B x C HBM allocation when the caller donates logits under jit.
            input_output_aliases={2: 0},
            cost_estimate=cost,
        )

    try:
        return _build(deep_pipeline)(labels2d, tprime, logits)
    except Exception:
        if not deep_pipeline:
            raise
        # Safety net: fall back to the default double-buffered pipeline.
        return _build(False)(labels2d, tprime, logits)


def _reference(logits, labels, s, m1, m2, m3):
    # pure-JAX reference mirroring the PyTorch code
    cos_m, sin_m = math.cos(m2), math.sin(m2)
    theta, sinmm = math.cos(math.pi - m2), math.sin(math.pi - m2) * m2
    B, C = logits.shape
    one_hot = (jnp.arange(C)[None, :] == labels[:, None]) & (labels[:, None] != -1)
    t = logits.astype(jnp.float32)
    if m1 == 1.0 and m3 == 0.0:
        sin_t = jnp.sqrt(1.0 - t * t)
        cos_t_m = t * cos_m - sin_t * sin_m
        final = jnp.where(t > theta, cos_t_m, t - sinmm)
    else:
        final = t - m3
    return (jnp.where(one_hot, final, t) * s).astype(logits.dtype)


if __name__ == "__main__":
    key = jax.random.PRNGKey(0)

    def run_case(B, C, s, m1, m2, m3, case_key, **tile_kw):
        k1, k2 = jax.random.split(case_key)
        # logits emulate cosine similarities in (-1, 1)
        logits = jax.random.uniform(k1, (B, C), jnp.float32, minval=-0.99, maxval=0.99)
        labels = jax.random.randint(k2, (B,), 0, C, dtype=jnp.int32)
        labels = labels.at[B // 2].set(-1)          # one "ignored" row
        ref = _reference(logits, labels, s, m1, m2, m3)   # compute ref before (aliased) call
        out = combined_margin_loss(logits, labels, s=s, m1=m1, m2=m2, m3=m3, **tile_kw)
        out = jax.block_until_ready(out)
        assert out.shape == (B, C) and out.dtype == logits.dtype
        assert jnp.allclose(out, ref, atol=1e-4, rtol=1e-4), (B, C, m1, m2, m3)

    k0, k1, k2 = jax.random.split(key, 3)
    # ArcFace configuration (m1=1, m2=0.5, m3=0); full-row tile_c == C
    run_case(8, 256, 64.0, 1.0, 0.5, 0.0, k0)
    # CosFace configuration (m3 > 0)
    run_case(8, 384, 64.0, 1.0, 0.0, 0.4, k1)
    # Ragged last column tile (C=320 with forced 128-wide tiles) -> cdiv grid + masked store,
    # exercises the label-shift-by-column-tile path.
    run_case(16, 320, 64.0, 1.0, 0.5, 0.0, k2, tile_b=8, tile_c=128)

    print("KERNEL_OK")
</pallas_src>

<mosaic_0001>
module attributes {stable_mosaic.version = 11 : i64} {
  func.func @kernel(%arg0: i32, %arg1: i32, %arg2: memref<8x1xi32, #tpu.memory_space<vmem>>, %arg3: memref<8x1xf32, #tpu.memory_space<vmem>>, %arg4: memref<8x256xf32, #tpu.memory_space<vmem>>, %arg5: memref<8x256xf32, #tpu.memory_space<vmem>>) attributes {dimension_semantics = [#tpu.dimension_semantics<parallel>, #tpu.dimension_semantics<parallel>], iteration_bounds = array<i64: 1, 1>, scalar_prefetch = 0 : i64, scratch_operands = 0 : i64, tpu.core_type = #tpu.core_type<tc>, window_params = [{transform_indices = @transform_0, window_bounds = array<i64: 8, 1>}, {transform_indices = @transform_1, window_bounds = array<i64: 8, 1>}, {transform_indices = @transform_2, window_bounds = array<i64: 8, 256>}, {transform_indices = @transform_3, window_bounds = array<i64: 8, 256>}]} {
    %c0 = arith.constant 0 : index
    %c0_0 = arith.constant 0 : index
    %0 = vector.load %arg4[%c0, %c0_0] : memref<8x256xf32, #tpu.memory_space<vmem>>, vector<8x256xf32>
    %c0_1 = arith.constant 0 : index
    %c0_2 = arith.constant 0 : index
    %1 = vector.load %arg2[%c0_1, %c0_2] : memref<8x1xi32, #tpu.memory_space<vmem>>, vector<8x1xi32>
    %c256_i32 = arith.constant 256 : i32
    %2 = arith.muli %arg1, %c256_i32 : i32
    %3 = vector.broadcast %2 : i32 to vector<8x1xi32>
    %4 = arith.subi %1, %3 : vector<8x1xi32>
    %5 = tpu.iota {dimensions = array<i32: 1>} : vector<1x256xi32>
    %6 = vector.broadcast %5 : vector<1x256xi32> to vector<8x256xi32>
    %7 = vector.broadcast %4 : vector<8x1xi32> to vector<8x256xi32>
    %8 = arith.cmpi eq, %6, %7 : vector<8x256xi32>
    %c0_3 = arith.constant 0 : index
    %c0_4 = arith.constant 0 : index
    %9 = vector.load %arg3[%c0_3, %c0_4] : memref<8x1xf32, #tpu.memory_space<vmem>>, vector<8x1xf32>
    %10 = vector.shape_cast %9 : vector<8x1xf32> to vector<8x1xf32>
    %11 = vector.broadcast %10 : vector<8x1xf32> to vector<8x256xf32>
    %12 = arith.select %8, %11, %0 : vector<8x256xi1>, vector<8x256xf32>
    %cst = arith.constant 6.400000e+01 : f32
    %13 = vector.broadcast %cst : f32 to vector<8x256xf32>
    %14 = arith.mulf %12, %13 : vector<8x256xf32>
    %c0_5 = arith.constant 0 : index
    %c0_6 = arith.constant 0 : index
    %15 = vector.load %arg5[%c0_5, %c0_6] : memref<8x256xf32, #tpu.memory_space<vmem>>, vector<8x256xf32>
    tpu.vector_store %arg5[%c0_5, %c0_6], %14 {strides = array<i32>} : memref<8x256xf32, #tpu.memory_space<vmem>>, vector<8x256xf32>,
    return
  }
  func.func @transform_0(%arg0: i32, %arg1: i32) -> (i32, i32) {
    %c0_i32 = arith.constant 0 : i32
    %c0_i32_0 = arith.constant 0 : i32
    return %arg0, %c0_i32 : i32, i32
  }
  func.func @transform_1(%arg0: i32, %arg1: i32) -> (i32, i32) {
    %c0_i32 = arith.constant 0 : i32
    %c0_i32_0 = arith.constant 0 : i32
    return %arg0, %c0_i32 : i32, i32
  }
  func.func @transform_2(%arg0: i32, %arg1: i32) -> (i32, i32) {
    %c0_i32 = arith.constant 0 : i32
    return %arg0, %arg1 : i32, i32
  }
  func.func @transform_3(%arg0: i32, %arg1: i32) -> (i32, i32) {
    %c0_i32 = arith.constant 0 : i32
    return %arg0, %arg1 : i32, i32
  }
}

</mosaic_0001>

<bundles_post_ra>
// kernel: tpu_custom_call.1
= control target key start
LH: loop header
LB: loop body
LE: loop exit
PB: predicated region body
PF: predicated region fallthrough
CT: control target
= control target key end

     0   :  { %8 = vsyncpa [#allocation3], 0  ;;  %s163_s0 = inlined_call_operand.vmem [shape: s32[8,1], index: 0, kind: input, shape index: {}]   ;;  %s164_s1 = inlined_call_operand.vmem [shape: f32[8,1], index: 1, kind: input, shape index: {}]   ;;  %s165_s2 = inlined_call_operand.hbm [shape: f32[8,256], index: 2, kind: input, shape index: {}, may-alias: {2,3}]   ;;  %s166_s3 = inlined_call_operand.hbm [shape: f32[8,256], index: 3, kind: output, shape index: {}, may-alias: {2,3}]  }
   0x1   :  { %9 = vsyncpa [#allocation4], 0  ;;  %s19_s14 = sshll.u32 %s165_s2, 4  ;;  %s128_s15 = smov [#allocation2]   ;;  %s20_s14 = int_to_ptr.hbm [resolvable:$true] %s19_s14 }
   0x2   :  { %s21_s16 = sshll.u32 %s128_s15, 4  ;;  %s22_s16 = int_to_ptr.vmem [resolvable:$true] %s21_s16 }
   0x3   :  { %24 = dma.hbm_to_vmem [thread:$0]  %s20_s14, 256, %s22_s16, [#allocation3]  }
   0x4   :  { %124 = dma.done.wait [#allocation3], 256  }
   0x5   :  { %125 = vsyncadd [#allocation3], 4294967040  ;;  %v129_v0 = vmov 0   ;;  %v31_v1 = vld [vmem:[%s163_s0] sm:$0xff]  ;;  %v35_v3 = vlaneseq  ;;  %v30_v8 = vld [vmem:[#allocation2 + $0x8] sm:$0xff]  ;;  %s130_s2 = smov [#allocation5]  }
   0x6   :  { %75 = vset.pattern.permute.xlu0 %v129_v0  ;;  %v43_v2 = vld [vmem:[%s164_s1] sm:$0xff]  ;;  %s60_s21 = sshll.u32 %s130_s2, 4  ;;  %s62_s0 = sshll.u32 %s166_s3, 4  ;;  %s61_s21 = int_to_ptr.vmem [resolvable:$true] %s60_s21  ;;  %s63_s0 = int_to_ptr.hbm [resolvable:$true] %s62_s0 }
   0x7   :  { %39 = vperm.xlu0 %75, %v31_v1   ;;  %v36_v4 = vand.u32 127, %v35_v3  ;;  %v29_v7 = vld [vmem:[#allocation2] sm:$0xff] }
   0x9   :  { %v37_v6 = vadd.s32 128, %v36_v4 }
   0xf   :  { %46 = vperm.xlu0 %75, %v43_v2  }
  0x79   :  { %v40_v5 = vpop.permute.xlu0 %39 }
  0x7a   :  { %vm41_vm0 = vcmp.eq.s32.totalorder %v36_v4, %v40_v5  ;;  %vm42_vm1 = vcmp.eq.s32.totalorder %v37_v6, %v40_v5 }
  0x81   :  { %v47_v9 = vpop.permute.xlu0 %46 }
  0x82   :  { %v49_v10 = vsel %vm41_vm0, %v47_v9, %v29_v7  ;;  %v50_v11 = vsel %vm42_vm1, %v47_v9, %v30_v8 }
  0x83   :  { %v51_v12 = vmul.f32 64.0, %v49_v10  ;;  %v52_v13 = vmul.f32 64.0, %v50_v11 }
  0x85   :  { %53 = vst [vmem:[#allocation5] sm:$0xff] %v51_v12 }
  0x86   :  { %54 = vst [vmem:[#allocation5 + $0x8] sm:$0xff] %v52_v13 }
  0x87   :  { %65 = dma.vmem_to_hbm [thread:$0]  %s61_s21, 256, %s63_s0, [#allocation4]  }
  0x88   :  { %126 = dma.done.wait [#allocation4], 256  }
  0x89   :  { %127 = vsyncadd [#allocation4], 4294967040 }
  0x8a   :  { %70 = vsyncpa [#allocation3], 1 }
  0x8b   :  { %71 = vsyncpa [#allocation4], 1 }

</bundles_post_ra>
